<compile_context>
chip_gen: v7x
topology: tpu7x:2x2x1
jax: 0.10.0
libtpu: 0.0.40
codegen_flags: <defaults>
</compile_context>

<pallas_src>
import jax
import jax.numpy as jnp
from jax import lax
from jax.experimental import pallas as pl
from jax.experimental.pallas import tpu as pltpu


def _round_up(x, m):
    return ((x + m - 1) // m) * m


def state_value_kernel(x_ref, w1T_ref, b1_ref, w2T_ref, b2_ref, o_ref):
    # x_ref: (TB, obs) f32, natural layout. Cast in-kernel (no wrapper-side extra HBM pass).
    xb = x_ref[...].astype(jnp.bfloat16)
    # Layer 1 with batch on lanes: contract obs of W1^T (hid, obs) with obs of x (TB, obs)
    # -> h^T (hid, TB).  A @ B^T form; Mosaic handles the small transpose internally.
    h = lax.dot_general(
        w1T_ref[...], xb,
        dimension_numbers=(((1,), (1,)), ((), ())),
        preferred_element_type=jnp.float32,
    )
    # Bias + ReLU in f32 on the VPU (portable to v5e; b1 is a (hid, 1) column, broadcasts
    # along lanes).
    h = jnp.maximum(h + b1_ref[...], 0.0)
    # Layer 2: (1, hid) @ (hid, TB) -> lane-dense (1, TB) output slab.
    v = jnp.dot(w2T_ref[...], h.astype(jnp.bfloat16),
                preferred_element_type=jnp.float32)
    # b2 is a scalar read from SMEM.
    o_ref[...] = v + b2_ref[0, 0]


def prepare_params(w1, b1, w2, b2):
    """One-time weight prep (transpose + bf16 cast), hoisted out of the per-call path."""
    hid = w1.shape[1]
    return (
        w1.T.astype(jnp.bfloat16),                # (hid, obs)
        b1.reshape(hid, 1).astype(jnp.float32),   # (hid, 1) column
        w2.T.astype(jnp.bfloat16),                # (1, hid)
        b2.reshape(1, 1).astype(jnp.float32),     # (1, 1) scalar -> SMEM
    )


def state_value_forward(x, params, *, block_b=8192):
    """x: (B, obs) f32; params: prepare_params(...) output. Returns (B, 1) f32."""
    B, obs = x.shape
    w1T, b1c, w2T, b2s = params
    hid = w1T.shape[0]

    # Batch tile: multiple of 128 (lane width), capped at block_b.  For large B pick TB
    # so the grid has >= 2 steps (v7x: shard the parallel batch axis across both cores).
    TB = min(block_b, max(128, _round_up(pl.cdiv(B, 2), 128)))
    grid = (pl.cdiv(B, TB),)  # ragged last block: OOB lanes are garbage, stores are masked

    cost = pl.CostEstimate(
        flops=2 * B * obs * hid + 2 * B * hid,
        transcendentals=0,
        bytes_accessed=4 * B * obs + 2 * hid * obs + 4 * hid + 2 * hid + 4 + 4 * B,
    )

    out_t = pl.pallas_call(
        state_value_kernel,
        out_shape=jax.ShapeDtypeStruct((1, B), jnp.float32),
        grid=grid,
        in_specs=[
            pl.BlockSpec((TB, obs), lambda i: (i, 0)),            # x batch tile (natural layout)
            pl.BlockSpec((hid, obs), lambda i: (0, 0)),           # W1^T (whole)
            pl.BlockSpec((hid, 1), lambda i: (0, 0)),             # b1 column (whole)
            pl.BlockSpec((1, hid), lambda i: (0, 0)),             # W2^T (whole)
            pl.BlockSpec(memory_space=pltpu.MemorySpace.SMEM),    # b2 scalar
        ],
        out_specs=pl.BlockSpec((1, TB), lambda i: (0, i)),        # lane-dense (1, TB)
        compiler_params=pltpu.CompilerParams(
            dimension_semantics=("parallel",),
            vmem_limit_bytes=32 * 1024 * 1024,  # explicit headroom vs v5e's 16 MiB default
        ),
        cost_estimate=cost,
    )(x.astype(jnp.float32), w1T, b1c, w2T, b2s)

    # (1, B) -> (B, 1); trivial layout change, no pad rows to strip.
    return out_t.T


def init_params(key, observation_space, hidden=128):
    # Shapes match nn.Linear(obs, 128) / nn.Linear(128, 1); deterministic synthetic init.
    k1, k2, k3, k4 = jax.random.split(key, 4)
    bound1 = 1.0 / (observation_space ** 0.5)
    bound2 = 1.0 / (hidden ** 0.5)
    w1 = jax.random.uniform(k1, (observation_space, hidden), jnp.float32, -bound1, bound1)
    b1 = jax.random.uniform(k2, (hidden,), jnp.float32, -bound1, bound1)
    w2 = jax.random.uniform(k3, (hidden, 1), jnp.float32, -bound2, bound2)
    b2 = jax.random.uniform(k4, (1,), jnp.float32, -bound2, bound2)
    return w1, b1, w2, b2


if __name__ == "__main__":
    observation_space = 4   # CartPole-like observation
    batch = 8

    key = jax.random.PRNGKey(0)
    kx, kp = jax.random.split(key)
    x = jax.random.normal(kx, (batch, observation_space), jnp.float32)
    w1, b1, w2, b2 = init_params(kp, observation_space)

    # One-time weight prep (would be stored with the model in a real RL loop).
    params = prepare_params(w1, b1, w2, b2)

    out = state_value_forward(x, params)
    out = jax.block_until_ready(out)

    # Pure-JAX f32 reference of the forward semantics (kernel uses bf16 matmul operands,
    # so compare with a bf16-appropriate tolerance).
    ref = jnp.maximum(x @ w1 + b1[None, :], 0.0) @ w2 + b2[None, :]
    assert out.shape == (batch, 1), out.shape
    assert jnp.allclose(out, ref, atol=5e-2, rtol=5e-2), (out, ref)

    print("KERNEL_OK")
</pallas_src>

<mosaic_0001>
module attributes {stable_mosaic.version = 11 : i64} {
  func.func @state_value_kernel(%arg0: i32, %arg1: memref<128x4xf32, #tpu.memory_space<vmem>>, %arg2: memref<128x4xbf16, #tpu.memory_space<vmem>>, %arg3: memref<128x1xf32, #tpu.memory_space<vmem>>, %arg4: memref<1x128xbf16, #tpu.memory_space<vmem>>, %arg5: memref<1x1xf32, #tpu.memory_space<smem>>, %arg6: memref<1x128xf32, #tpu.memory_space<vmem>>) attributes {dimension_semantics = [#tpu.dimension_semantics<parallel>], iteration_bounds = array<i64: 1>, scalar_prefetch = 0 : i64, scratch_operands = 0 : i64, tpu.core_type = #tpu.core_type<tc>, window_params = [{transform_indices = @transform_0, window_bounds = array<i64: 128, 4>}, {pipeline_mode = #tpu.pipeline_mode<synchronous>, transform_indices = @transform_1, window_bounds = array<i64: 128, 4>}, {pipeline_mode = #tpu.pipeline_mode<synchronous>, transform_indices = @transform_2, window_bounds = array<i64: 128, 1>}, {pipeline_mode = #tpu.pipeline_mode<synchronous>, transform_indices = @transform_3, window_bounds = array<i64: 1, 128>}, {transform_indices = @transform_4, window_bounds = array<i64: 1, 1>}, {transform_indices = @transform_5, window_bounds = array<i64: 1, 128>}]} {
    %c0 = arith.constant 0 : index
    %c0_0 = arith.constant 0 : index
    %0 = vector.load %arg1[%c0, %c0_0] : memref<128x4xf32, #tpu.memory_space<vmem>>, vector<128x4xf32>
    %1 = arith.truncf %0 : vector<128x4xf32> to vector<128x4xbf16>
    %c0_1 = arith.constant 0 : index
    %c0_2 = arith.constant 0 : index
    %2 = vector.load %arg2[%c0_1, %c0_2] : memref<128x4xbf16, #tpu.memory_space<vmem>>, vector<128x4xbf16>
    %cst = arith.constant dense<0.000000e+00> : vector<128x128xf32>
    %3 = tpu.matmul %2, %1, %cst {dimension_numbers = #tpu.dot_dimension_numbers<[1], [1], [0], [0], [0, 0, 1, 0], [], []>} : vector<128x4xbf16>, vector<128x4xbf16>, vector<128x128xf32> -> vector<128x128xf32>
    %c0_3 = arith.constant 0 : index
    %c0_4 = arith.constant 0 : index
    %4 = vector.load %arg3[%c0_3, %c0_4] : memref<128x1xf32, #tpu.memory_space<vmem>>, vector<128x1xf32>
    %5 = vector.broadcast %4 : vector<128x1xf32> to vector<128x128xf32>
    %6 = arith.addf %3, %5 : vector<128x128xf32>
    %cst_5 = arith.constant 0.000000e+00 : f32
    %7 = vector.broadcast %cst_5 : f32 to vector<128x128xf32>
    %8 = arith.maximumf %6, %7 : vector<128x128xf32>
    %c0_6 = arith.constant 0 : index
    %c0_7 = arith.constant 0 : index
    %9 = vector.load %arg4[%c0_6, %c0_7] : memref<1x128xbf16, #tpu.memory_space<vmem>>, vector<1x128xbf16>
    %10 = arith.truncf %8 : vector<128x128xf32> to vector<128x128xbf16>
    %cst_8 = arith.constant dense<0.000000e+00> : vector<1x128xf32>
    %11 = tpu.matmul %9, %10, %cst_8 {dimension_numbers = #tpu.dot_dimension_numbers<[1], [0], [0], [1], [0, 0, 1, 1], [], []>} : vector<1x128xbf16>, vector<128x128xbf16>, vector<1x128xf32> -> vector<1x128xf32>
    %c0_9 = arith.constant 0 : index
    %c0_10 = arith.constant 0 : index
    %12 = memref.load %arg5[%c0_9, %c0_10] : memref<1x1xf32, #tpu.memory_space<smem>>
    %13 = vector.broadcast %12 : f32 to vector<1x128xf32>
    %14 = arith.addf %11, %13 : vector<1x128xf32>
    %c0_11 = arith.constant 0 : index
    %c0_12 = arith.constant 0 : index
    %15 = vector.load %arg6[%c0_11, %c0_12] : memref<1x128xf32, #tpu.memory_space<vmem>>, vector<1x128xf32>
    tpu.vector_store %arg6[%c0_11, %c0_12], %14 {strides = array<i32>} : memref<1x128xf32, #tpu.memory_space<vmem>>, vector<1x128xf32>,
    return
  }
  func.func @transform_0(%arg0: i32) -> (i32, i32) {
    %c0_i32 = arith.constant 0 : i32
    %c0_i32_0 = arith.constant 0 : i32
    return %arg0, %c0_i32 : i32, i32
  }
  func.func @transform_1(%arg0: i32) -> (i32, i32) {
    %c0_i32 = arith.constant 0 : i32
    %c0_i32_0 = arith.constant 0 : i32
    %c0_i32_1 = arith.constant 0 : i32
    return %c0_i32, %c0_i32_0 : i32, i32
  }
  func.func @transform_2(%arg0: i32) -> (i32, i32) {
    %c0_i32 = arith.constant 0 : i32
    %c0_i32_0 = arith.constant 0 : i32
    %c0_i32_1 = arith.constant 0 : i32
    return %c0_i32, %c0_i32_0 : i32, i32
  }
  func.func @transform_3(%arg0: i32) -> (i32, i32) {
    %c0_i32 = arith.constant 0 : i32
    %c0_i32_0 = arith.constant 0 : i32
    %c0_i32_1 = arith.constant 0 : i32
    return %c0_i32, %c0_i32_0 : i32, i32
  }
  func.func @transform_4(%arg0: i32) -> (i32, i32) {
    %c0_i32 = arith.constant 0 : i32
    %c0_i32_0 = arith.constant 0 : i32
    %c0_i32_1 = arith.constant 0 : i32
    return %c0_i32, %c0_i32_0 : i32, i32
  }
  func.func @transform_5(%arg0: i32) -> (i32, i32) {
    %c0_i32 = arith.constant 0 : i32
    %c0_i32_0 = arith.constant 0 : i32
    return %c0_i32, %arg0 : i32, i32
  }
}

</mosaic_0001>

<bundles_post_ra>
// kernel: tpu_custom_call.1
= control target key start
LH: loop header
LB: loop body
LE: loop exit
PB: predicated region body
PF: predicated region fallthrough
CT: control target
= control target key end

     0   :  { %vm199_vm0 = vcmask 31744   ;;  %v566_v5 = vmov 0   ;;  %s771_s0 = inlined_call_operand.vmem [shape: f32[8,4], index: 0, kind: input, shape index: {}]   ;;  %s772_s1 = inlined_call_operand.vmem [shape: bf16[128,4], index: 1, kind: input, shape index: {}]   ;;  %s773_s2 = inlined_call_operand.vmem [shape: f32[128,1], index: 2, kind: input, shape index: {}]   ;;  %s774_s3 = inlined_call_operand.vmem [shape: bf16[1,128], index: 3, kind: input, shape index: {}]   ;;  %s775_s4 = inlined_call_operand.<no memory space> [shape: f32[1,1], index: 4, kind: input, shape index: {}]   ;;  %s776_s5 = inlined_call_operand.hbm [shape: f32[1,8], index: 5, kind: output, shape index: {}]  }
   0x1   :  { %v23_v0 = vld [vmem:[%s771_s0] sm:$0xff]  ;;  %v24_v1 = vld [vmem:[%s771_s0 + $0x8] sm:$0xff]  ;;  %v25_v2 = vld [vmem:[%s771_s0 + $0x10] sm:$0xff]  ;;  %532 = vset.pattern.permute.xlu0 %v566_v5  ;;  %533 = vset.pattern.permute.xlu1 %v566_v5 }
   0x2   :  { %v39_v3 = vpack.c.bf16 %v24_v1, %v23_v0  ;;  %v26_v4 = vld [vmem:[%s771_s0 + $0x18] sm:$0xff]  ;;  %v27_v8 = vld [vmem:[%s771_s0 + $0x20] sm:$0xff]  ;;  %v28_v9 = vld [vmem:[%s771_s0 + $0x28] sm:$0xff] }
   0x3   :  { %v40_v6 = vpack.c.bf16 %v26_v4, %v25_v2  ;;  %v534_v10 = vld [vmem:[%s772_s1] sm:$0xff]   ;;  %v41_v12 = vpack.c.bf16 %v28_v9, %v27_v8  ;;  %v65_v14 = vld [vmem:[%s773_s2 + $0x10] sm:$0xff]  ;;  %v30_v16 = vld [vmem:[%s771_s0 + $0x38] sm:$0xff] }
   0x4   :  { %520 = vmatprep.subr.msk.bf16.mxu0 %vm199_vm0, %v39_v3  ;;  %v225_v7 = vsel %vm199_vm0, %v39_v3, 0  ;;  %484 = vmatprep.mubr.msk.bf16.mxu0 %vm199_vm0, %v534_v10  ;;  %v63_v13 = vld [vmem:[%s773_s2] sm:$0xff]  ;;  %v29_v15 = vld [vmem:[%s771_s0 + $0x30] sm:$0xff]  ;;  %v64_v17 = vld [vmem:[%s773_s2 + $0x8] sm:$0xff] }
   0x5   :  { %469 = vmatpush3.bf16.xpose.msra.mxu0 %v225_v7  ;;  %v228_v11 = vsel %vm199_vm0, %v40_v6, 0  ;;  %81 = vperm.xlu0 %532, %v63_v13   ;;  %v66_v18 = vld [vmem:[%s773_s2 + $0x18] sm:$0xff]  ;;  %v231_v19 = vsel %vm199_vm0, %v41_v12, 0  ;;  %v42_v20 = vpack.c.bf16 %v30_v16, %v29_v15 }
   0x6   :  { %521 = vmatprep.subr.msk.bf16.mxu0 %vm199_vm0, %v40_v6  ;;  %91 = vperm.xlu1 %533, %v65_v14  }
   0x9   :  { %86 = vperm.xlu0 %532, %v64_v17  }
   0xa   :  { %96 = vperm.xlu1 %533, %v66_v18  }
   0xd   :  { %471 = vmatpush3.bf16.xpose.msra.mxu0 %v228_v11 }
   0xe   :  { %522 = vmatprep.subr.msk.bf16.mxu0 %vm199_vm0, %v41_v12 }
   0xf   :  { %11 = vsyncpa [#allocation4], 0  ;;  %v67_v21 = vld [vmem:[%s773_s2 + $0x20] sm:$0xff]  ;;  %v68_v22 = vld [vmem:[%s773_s2 + $0x28] sm:$0xff]  ;;  %v234_v27 = vsel %vm199_vm0, %v42_v20, 0  ;;  %v567_v57 = vmov 0.0  }
  0x10   :  { %v31_v23 = vld [vmem:[%s771_s0 + $0x40] sm:$0xff]  ;;  %v32_v24 = vld [vmem:[%s771_s0 + $0x48] sm:$0xff]  ;;  %101 = vperm.xlu0 %532, %v67_v21   ;;  %106 = vperm.xlu1 %533, %v68_v22   ;;  %v69_v25 = vld [vmem:[%s773_s2 + $0x30] sm:$0xff]  ;;  %vm568_vm1 = vmmov 0   ;;  %s569_s24 = smov [#allocation3]  }
  0x11   :  { %v70_v26 = vld [vmem:[%s773_s2 + $0x38] sm:$0xff]  ;;  %v43_v28 = vpack.c.bf16 %v32_v24, %v31_v23  ;;  %v71_v29 = vld [vmem:[%s773_s2 + $0x40] sm:$0xff]  ;;  %v72_v30 = vld [vmem:[%s773_s2 + $0x48] sm:$0xff]  ;;  %500 = vmatprep.subr.bf16.mxu1 %v567_v57  ;;  %516 = vmatprep.mubr.msk.bf16.mxu1 %vm568_vm1, %v567_v57  ;;  %s419_s25 = sshll.u32 %s569_s24, 4  ;;  %s420_s25 = int_to_ptr.vmem [resolvable:$true] %s419_s25 }
  0x12   :  { %v33_v31 = vld [vmem:[%s771_s0 + $0x50] sm:$0xff]  ;;  %v34_v32 = vld [vmem:[%s771_s0 + $0x58] sm:$0xff]  ;;  %v75_v37 = vld [vmem:[%s773_s2 + $0x60] sm:$0xff]  ;;  %s542_s26 = scalar_lea.vmem %s420_s25, 16  ;;  %s546_s27 = scalar_lea.vmem %s420_s25, 32 }
  0x13   :  { %v73_v33 = vld [vmem:[%s773_s2 + $0x50] sm:$0xff]  ;;  %v74_v34 = vld [vmem:[%s773_s2 + $0x58] sm:$0xff]  ;;  %v237_v35 = vsel %vm199_vm0, %v43_v28, 0  ;;  %v44_v36 = vpack.c.bf16 %v34_v32, %v33_v31  ;;  %v76_v38 = vld [vmem:[%s773_s2 + $0x68] sm:$0xff]  ;;  %p543_p0 = scmp.ne.s32.totalorder %s420_s25, %s542_s26  ;;  %p547_p1 = scmp.lt.s32.totalorder %s420_s25, %s420_s25 }
  0x14   :  { %111 = vperm.xlu0 %532, %v69_v25   ;;  %116 = vperm.xlu1 %533, %v70_v26   ;;  %v35_v39 = vld [vmem:[%s771_s0 + $0x60] sm:$0xff]  ;;  %v36_v40 = vld [vmem:[%s771_s0 + $0x68] sm:$0xff]  ;;  %v77_v41 = vld [vmem:[%s773_s2 + $0x70] sm:$0xff]  ;;  %p548_p2 = scmp.lt.s32.totalorder %s546_s27, %s542_s26 }
  0x15   :  { %473 = vmatpush3.bf16.xpose.msra.mxu0 %v231_v19  ;;  %v78_v42 = vld [vmem:[%s773_s2 + $0x78] sm:$0xff]  ;;  %v240_v43 = vsel %vm199_vm0, %v44_v36, 0  ;;  %v45_v44 = vpack.c.bf16 %v36_v40, %v35_v39  ;;  %v37_v45 = vld [vmem:[%s771_s0 + $0x70] sm:$0xff]  ;;  %v535_v50 = vld [vmem:[%s772_s1 + $0x8] sm:$0xff]  }
  0x16   :  { %523 = vmatprep.subr.msk.bf16.mxu0 %vm199_vm0, %v42_v20  ;;  %v38_v46 = vld [vmem:[%s771_s0 + $0x78] sm:$0xff]  ;;  %v536_v51 = vld [vmem:[%s772_s1 + $0x10] sm:$0xff]   ;;  %v538_v53 = vld [vmem:[%s772_s1 + $0x20] sm:$0xff]   ;;  %p549_p3 = por %p548_p2, %p547_p1 }
  0x17   :  { %v243_v47 = vsel %vm199_vm0, %v45_v44, 0  ;;  %v46_v48 = vpack.c.bf16 %v38_v46, %v37_v45  ;;  %v537_v52 = vld [vmem:[%s772_s1 + $0x18] sm:$0xff]   ;;  %v539_v54 = vld [vmem:[%s772_s1 + $0x28] sm:$0xff]   ;;  %v540_v55 = vld [vmem:[%s772_s1 + $0x30] sm:$0xff]  }
  0x18   :  { %121 = vperm.xlu0 %532, %v71_v29   ;;  %126 = vperm.xlu1 %533, %v72_v30   ;;  %v541_v56 = vld [vmem:[%s772_s1 + $0x38] sm:$0xff]   ;;  %p550_p4 = pnand %p549_p3, %p543_p0 }
  0x19   :  { %v246_v49 = vsel %vm199_vm0, %v46_v48, 0 }
  0x1c   :  { %131 = vperm.xlu0 %532, %v73_v33   ;;  %136 = vperm.xlu1 %533, %v74_v34  }
  0x1d   :  { %475 = vmatpush3.bf16.xpose.msra.mxu0 %v234_v27 }
  0x1e   :  { %524 = vmatprep.subr.msk.bf16.mxu0 %vm199_vm0, %v43_v28 }
  0x20   :  { %141 = vperm.xlu0 %532, %v75_v37   ;;  %146 = vperm.xlu1 %533, %v76_v38  }
  0x24   :  { %151 = vperm.xlu0 %532, %v77_v41   ;;  %156 = vperm.xlu1 %533, %v78_v42  }
  0x25   :  { %477 = vmatpush3.bf16.xpose.msra.mxu0 %v237_v35 }
  0x26   :  { %525 = vmatprep.subr.msk.bf16.mxu0 %vm199_vm0, %v44_v36 }
  0x2d   :  { %479 = vmatpush3.bf16.xpose.msra.mxu0 %v240_v43 }
  0x2e   :  { %526 = vmatprep.subr.msk.bf16.mxu0 %vm199_vm0, %v45_v44 }
  0x35   :  { %481 = vmatpush3.bf16.xpose.msra.mxu0 %v243_v47 }
  0x36   :  { %527 = vmatprep.subr.msk.bf16.mxu0 %vm199_vm0, %v46_v48 }
  0x3d   :  { %483 = vmatpush3.bf16.xpose.msra.mxu0 %v246_v49 }
  0x44   :  { %485 = vmatmul.mubr.msk.bf16.vlgmr.msra.gmra.mrb[0].mxu0 %vm199_vm0, %v535_v50 }
  0x45   :  { %488 = vmatprep.mubr.msk.bf16.mxu0 %vm199_vm0, %v536_v51 }
  0x4c   :  { %489 = vmatmul.mubr.msk.bf16.gmra.mrb[4].mxu0 %vm199_vm0, %v537_v52 }
  0x4d   :  { %492 = vmatprep.mubr.msk.bf16.mxu0 %vm199_vm0, %v538_v53 }
  0x54   :  { %493 = vmatmul.mubr.msk.bf16.gmra.mrb[8].mxu0 %vm199_vm0, %v539_v54 }
  0x55   :  { %496 = vmatprep.mubr.msk.bf16.mxu0 %vm199_vm0, %v540_v55 }
  0x5c   :  { %497 = vmatmul.mubr.msk.bf16.gmra.mrb[12].mxu0 %vm199_vm0, %v541_v56 }
  0x84   :  { %v82_v58 = vpop.permute.xlu0 %81 }
  0x85   :  { %v92_v59 = vpop.permute.xlu1 %91 }
  0x88   :  { %v87_v60 = vpop.permute.xlu0 %86 }
  0x89   :  { %v97_v61 = vpop.permute.xlu1 %96 }
  0x8f   :  { %v102_v62 = vpop.permute.xlu0 %101  ;;  %v107_v63 = vpop.permute.xlu1 %106 }
  0x93   :  { %v112_v0 = vpop.permute.xlu0 %111  ;;  %v117_v4 = vpop.permute.xlu1 %116 }
  0x97   :  { %v122_v12 = vpop.permute.xlu0 %121  ;;  %v127_v16 = vpop.permute.xlu1 %126 }
  0x9b   :  { %v132_v25 = vpop.permute.xlu0 %131  ;;  %v137_v29 = vpop.permute.xlu1 %136 }
  0x9f   :  { %v142_v37 = vpop.permute.xlu0 %141  ;;  %v147_v42 = vpop.permute.xlu1 %146 }
  0xa3   :  { %v152_v49 = vpop.permute.xlu0 %151  ;;  %v157_v54 = vpop.permute.xlu1 %156 }
 0x117   :  { %v486_v1 = vpop.f32.mrb[0].mxu0 }
 0x118   :  { %v291_v2 = vadd.f32 %v486_v1, %v92_v59  ;;  %v282_v3 = vpop.f32.mrb[1].mxu0 }
 0x119   :  { %v283_v5 = vadd.f32 %v282_v3, %v82_v58  ;;  %v487_v6 = vpop.f32.mrb[2].mxu0  ;;  %v361_v3 = vld [vmem:[%s774_s3] sm:$0x1] }
 0x11a   :  { %v294_v7 = vadd.f32 %v487_v6, %v97_v61  ;;  %v285_v8 = vpop.f32.mrb[3].mxu0  ;;  %v347_v10 = vmax.f32 %v291_v2, 0.0 }
 0x11b   :  { %v286_v9 = vadd.f32 %v285_v8, %v87_v60  ;;  %v345_v13 = vmax.f32 %v283_v5, 0.0 }
 0x11c   :  { %v348_v11 = vmax.f32 %v294_v7, 0.0 }
 0x11d   :  { %v346_v14 = vmax.f32 %v286_v9, 0.0 }
 0x11e   :  { %v363_v15 = vpack.c.bf16 %v348_v11, %v347_v10 }
 0x11f   :  { %v490_v17 = vpop.f32.mrb[4].mxu0  ;;  %v362_v18 = vpack.c.bf16 %v346_v14, %v345_v13 }
 0x120   :  { %v307_v19 = vadd.f32 %v490_v17, %v112_v0  ;;  %v298_v20 = vpop.f32.mrb[5].mxu0 }
 0x121   :  { %v299_v21 = vadd.f32 %v298_v20, %v102_v62  ;;  %v491_v22 = vpop.f32.mrb[6].mxu0  ;;  %501 = vmatpush3.bf16.msra.mxu1 %v362_v18 }
 0x122   :  { %v310_v23 = vadd.f32 %v491_v22, %v117_v4  ;;  %v301_v24 = vpop.f32.mrb[7].mxu0  ;;  %502 = vmatprep.subr.bf16.mxu1 %v567_v57  ;;  %v351_v27 = vmax.f32 %v307_v19, 0.0  ;;  %v371_v4 = vstv %s775_s4 }
 0x123   :  { %v302_v26 = vadd.f32 %v301_v24, %v107_v63  ;;  %v349_v30 = vmax.f32 %v299_v21, 0.0 }
 0x124   :  { %v352_v28 = vmax.f32 %v310_v23, 0.0 }
 0x125   :  { %v350_v31 = vmax.f32 %v302_v26, 0.0  ;;  %503 = vmatpush3.bf16.msra.mxu1 %v363_v15 }
 0x126   :  { %v365_v32 = vpack.c.bf16 %v352_v28, %v351_v27  ;;  %504 = vmatprep.subr.bf16.mxu1 %v567_v57 }
 0x127   :  { %v364_v33 = vpack.c.bf16 %v350_v31, %v349_v30  ;;  %v494_v34 = vpop.f32.mrb[8].mxu0 }
 0x128   :  { %v323_v35 = vadd.f32 %v494_v34, %v132_v25  ;;  %v314_v36 = vpop.f32.mrb[9].mxu0 }
 0x129   :  { %v315_v38 = vadd.f32 %v314_v36, %v122_v12  ;;  %v495_v39 = vpop.f32.mrb[10].mxu0  ;;  %505 = vmatpush3.bf16.msra.mxu1 %v364_v33 }
 0x12a   :  { %v326_v40 = vadd.f32 %v495_v39, %v137_v29  ;;  %v317_v41 = vpop.f32.mrb[11].mxu0  ;;  %506 = vmatprep.subr.bf16.mxu1 %v567_v57  ;;  %v355_v44 = vmax.f32 %v323_v35, 0.0 }
 0x12b   :  { %v318_v43 = vadd.f32 %v317_v41, %v127_v16  ;;  %v353_v46 = vmax.f32 %v315_v38, 0.0 }
 0x12c   :  { %v356_v45 = vmax.f32 %v326_v40, 0.0 }
 0x12d   :  { %v354_v47 = vmax.f32 %v318_v43, 0.0  ;;  %507 = vmatpush3.bf16.msra.mxu1 %v365_v32 }
 0x12e   :  { %v367_v48 = vpack.c.bf16 %v356_v45, %v355_v44  ;;  %508 = vmatprep.subr.bf16.mxu1 %v567_v57 }
 0x12f   :  { %v366_v50 = vpack.c.bf16 %v354_v47, %v353_v46  ;;  %v498_v51 = vpop.f32.mrb[12].mxu0 }
 0x130   :  { %v339_v52 = vadd.f32 %v498_v51, %v152_v49  ;;  %v330_v53 = vpop.f32.mrb[13].mxu0 }
 0x131   :  { %v331_v55 = vadd.f32 %v330_v53, %v142_v37  ;;  %v499_v56 = vpop.f32.mrb[14].mxu0  ;;  %509 = vmatpush3.bf16.msra.mxu1 %v366_v50 }
 0x132   :  { %v342_v58 = vadd.f32 %v499_v56, %v157_v54  ;;  %v333_v59 = vpop.f32.mrb[15].mxu0  ;;  %510 = vmatprep.subr.bf16.mxu1 %v567_v57  ;;  %v359_v61 = vmax.f32 %v339_v52, 0.0 }
 0x133   :  { %v334_v60 = vadd.f32 %v333_v59, %v147_v42  ;;  %v357_v63 = vmax.f32 %v331_v55, 0.0 }
 0x134   :  { %v360_v62 = vmax.f32 %v342_v58, 0.0 }
 0x135   :  { %v358_v0 = vmax.f32 %v334_v60, 0.0  ;;  %511 = vmatpush3.bf16.msra.mxu1 %v367_v48 }
 0x136   :  { %v369_v1 = vpack.c.bf16 %v360_v62, %v359_v61  ;;  %512 = vmatprep.subr.bf16.mxu1 %v567_v57 }
 0x137   :  { %v368_v2 = vpack.c.bf16 %v358_v0, %v357_v63 }
 0x139   :  { %513 = vmatpush3.bf16.msra.mxu1 %v368_v2 }
 0x13a   :  { %514 = vmatprep.subr.bf16.mxu1 %v567_v57 }
 0x13d   :  { %515 = vmatpush3.bf16.msra.mxu1 %v369_v1 }
 0x140   :  { %517 = vmatmul.mubr.bf16.vlgmr.msra.gmra.mrb[0].mxu1 %v361_v3 }
 0x213   :  { %v406_v5 = vpop.f32.mrb[0].mxu1 }
 0x214   :  { %v407_v6 = vadd.f32 %v406_v5, %v371_v4  ;;  %v518_v7 = vpop.f32.mrb[1].mxu1 }
 0x215   :  { %v409_v8 = vpop.f32.mrb[2].mxu1 }
 0x216   :  { %412 = vst [vmem:[#allocation3] sm:$0x1] %v407_v6  ;;  %v519_v9 = vpop.f32.mrb[3].mxu1 }
 0x217   :  { %553 = shalt.err (!%p550_p4)
}
 0x218   :  { %s554_s4 = scalar_lea.hbm %s776_s5, 16 }
 0x219   :  { %p555_p5 = scmp.ne.s32.totalorder %s776_s5, %s554_s4  ;;  %p558_p6 = scmp.lt.u32.totalorder %s554_s4, %s776_s5 }
 0x21b   :  { %p560_p7 = pnand %p558_p6, %p555_p5 }
 0x21d   :  { %563 = shalt.err (!%p560_p7)
}
 0x21e   :  { %422 = dma.vmem_to_hbm [thread:$0]  %s420_s25, 16, %s776_s5, [#allocation4]  }
 0x21f   :  { %564 = dma.done.wait [#allocation4], 16  }
 0x220   :  { %565 = vsyncadd [#allocation4], 4294967280 }
 0x221   :  { %426 = vsyncpa [#allocation4], 1 }

</bundles_post_ra>
